<compile_context>
chip_gen: v5e
topology: v5e:2x2
jax: 0.10.0
libtpu: 0.0.40
codegen_flags: <defaults>
</compile_context>

<pallas_src>
import jax
import jax.numpy as jnp
from jax.experimental import pallas as pl
from jax.experimental.pallas import tpu as pltpu


def _round_up(x, m):
    return (x + m - 1) // m * m


def _cdiv(a, b):
    return -(-a // b)


def _pick_vmem_limit_bytes():
    """Generation-aware VMEM request: leave headroom below physical capacity."""
    try:
        cap = int(pltpu.get_tpu_info().vmem_capacity_bytes)
    except Exception:
        cap = 64 * 1024 * 1024  # conservative (v7x-sized) fallback
    # Never request the full physical VMEM (compiler needs scratch/spill room);
    # cap at ~100 MiB even on 128 MiB parts.
    return max(32 * 1024 * 1024, min(cap - 16 * 1024 * 1024, 100 * 1024 * 1024))


def swiglu_kernel(x_ref, wi_main_ref, wi_gate_ref, wo_ref, o_ref, acc_ref):
    """One (row-tile, hidden-tile) grid step.

    x_ref:       (tm, D)   input rows (residual + RMSNorm source)
    wi_main_ref: (D, th)   scale-folded main projection slice (bf16)
    wi_gate_ref: (D, th)   scale-folded gate projection slice (bf16)
    wo_ref:      (th, D)   output projection slice (bf16)
    o_ref:       (tm, D)   output rows
    acc_ref:     (tm, D)   fp32 accumulator scratch (persists across h steps)
    """
    h = pl.program_id(1)

    @pl.when(h == 0)
    def _():
        acc_ref[...] = jnp.zeros_like(acc_ref)

    x = x_ref[...].astype(jnp.float32)                 # residual / norm source
    d = x.shape[-1]
    eps = 1e-8

    # RMSNorm: x / (||x||_2 * D^-0.5 + eps).  Per-feature scales are folded
    # into the wi rows in the wrapper, so no (tm, D) scale multiply here.
    sq_sum = jnp.sum(x * x, axis=-1, keepdims=True)    # (tm, 1)
    norm = jnp.sqrt(sq_sum) * (d ** -0.5)
    inv = pl.reciprocal(norm + eps, approx=True)       # EUP slot, off the VALU path
    xn = x * inv

    # Matmuls run in the weights' (bf16) dtype on the MXU, fp32 accumulation.
    xn_mm = xn.astype(wi_main_ref.dtype)
    h_main = jnp.dot(xn_mm, wi_main_ref[...], preferred_element_type=jnp.float32)
    h_gate = jnp.dot(xn_mm, wi_gate_ref[...], preferred_element_type=jnp.float32)
    g = h_main * jax.nn.sigmoid(h_gate)                # (tm, th) fp32 swish-gate

    acc_ref[...] += jnp.dot(g.astype(wo_ref.dtype), wo_ref[...],
                            preferred_element_type=jnp.float32)

    @pl.when(h == pl.num_programs(1) - 1)
    def _():
        o_ref[...] = (acc_ref[...] + x).astype(o_ref.dtype)


def swiglu_forward(x, rms_scale, split_scale, wi_weight, wo_weight, *,
                   tm=512, th=512, mm_dtype=jnp.bfloat16):
    """x: [B, T, D]; wi_weight: [2H, D]; wo_weight: [D, H] (PyTorch nn.Linear layout).

    tm: row tile (multiple of 8).  With streamed weights, roofline-guided
        defaults are ~256-384 on v5e, ~768-1024 on v6e, ~384-512 on v7x.
    th: hidden tile (multiple of 128).
    mm_dtype: dtype fed to the MXU (bf16 for peak throughput).
    """
    B, T, D = x.shape
    H2, D_in = wi_weight.shape
    assert D_in == D
    H = H2 // 2
    assert wo_weight.shape == (D, H)
    assert tm % 8 == 0 and th % 128 == 0

    N = B * T
    x2d = x.reshape(N, D)

    # --- Row tiling with minimal tail padding (8-aligned, <= tm). ---
    N8 = _round_up(N, 8)
    n_row_tiles = _cdiv(N8, tm)
    tm_eff = _round_up(_cdiv(N8, n_row_tiles), 8)
    N_pad = tm_eff * n_row_tiles
    if N_pad != N:
        # Zero rows: norm=0 -> xn=0 -> matmul contribution 0; sliced off below.
        x2d = jnp.pad(x2d, ((0, N_pad - N), (0, 0)))

    # --- Hidden-dim tiling (pad H to a multiple of th_eff with zero cols/rows). ---
    if H <= th:
        th_eff, H_pad = H, H
    else:
        th_eff = th
        H_pad = _round_up(H, th_eff)
    n_h_tiles = H_pad // th_eff

    # --- Parameter massaging (all hoisted out of the kernel). ---
    # Fold both per-feature scales along the contraction dim of wi:
    #   (scale * xn) @ W  ==  xn @ (scale[:, None] * W)
    combined = (rms_scale * split_scale).astype(jnp.float32).reshape(D, 1)
    wi_main_t = wi_weight[:H, :].astype(jnp.float32).T * combined      # (D, H)
    wi_gate_t = wi_weight[H:, :].astype(jnp.float32).T * combined      # (D, H)
    wo_t = wo_weight.astype(jnp.float32).T                             # (H, D)
    if H_pad != H:
        wi_main_t = jnp.pad(wi_main_t, ((0, 0), (0, H_pad - H)))
        wi_gate_t = jnp.pad(wi_gate_t, ((0, 0), (0, H_pad - H)))
        wo_t = jnp.pad(wo_t, ((0, H_pad - H), (0, 0)))
    wi_main_t = wi_main_t.astype(mm_dtype)
    wi_gate_t = wi_gate_t.astype(mm_dtype)
    wo_t = wo_t.astype(mm_dtype)

    x_bytes = jnp.dtype(x.dtype).itemsize
    w_bytes = jnp.dtype(mm_dtype).itemsize
    cost = pl.CostEstimate(
        flops=6 * N_pad * D * H_pad,                            # 2*N*D*2H + 2*N*H*D
        transcendentals=N_pad * (H_pad + 2 * n_h_tiles),        # sigmoid + sqrt/rcp
        bytes_accessed=(2 * N_pad * D * x_bytes                 # x in (once/row tile) + out
                        + n_row_tiles * 3 * D * H_pad * w_bytes),  # weights re-streamed
    )

    grid = (n_row_tiles, n_h_tiles)

    def run(single_buffer_weights):
        w_kw = dict(pipeline_mode=pl.Buffered(1)) if single_buffer_weights else {}
        return pl.pallas_call(
            swiglu_kernel,
            out_shape=jax.ShapeDtypeStruct((N_pad, D), x.dtype),
            grid_spec=pltpu.PrefetchScalarGridSpec(
                num_scalar_prefetch=0,
                grid=grid,
                in_specs=[
                    pl.BlockSpec((tm_eff, D), lambda i, h: (i, 0)),        # x rows
                    pl.BlockSpec((D, th_eff), lambda i, h: (0, h), **w_kw),  # wi_main^T
                    pl.BlockSpec((D, th_eff), lambda i, h: (0, h), **w_kw),  # wi_gate^T
                    pl.BlockSpec((th_eff, D), lambda i, h: (h, 0), **w_kw),  # wo^T
                ],
                out_specs=pl.BlockSpec((tm_eff, D), lambda i, h: (i, 0)),
                scratch_shapes=[pltpu.VMEM((tm_eff, D), jnp.float32)],
            ),
            compiler_params=pltpu.CompilerParams(
                dimension_semantics=("parallel", "arbitrary"),
                vmem_limit_bytes=_pick_vmem_limit_bytes(),
            ),
            cost_estimate=cost,
        )(x2d, wi_main_t, wi_gate_t, wo_t)

    if n_h_tiles == 1:
        # Constant-index weight blocks: double buffering buys nothing, so
        # single-buffer them (half the weight VMEM residency).
        try:
            out2d = run(True)
        except Exception:
            # TODO(synk): drop this fallback once pl.Buffered(1) is guaranteed
            # on all deployed jax versions.
            out2d = run(False)
    else:
        out2d = run(False)

    return out2d[:N].reshape(B, T, D)


def swiglu_reference(x, rms_scale, split_scale, wi_weight, wo_weight):
    # Mirrors the PyTorch module exactly (un-folded scales, single fused wi).
    eps = 1e-8
    D = x.shape[-1]
    residual = x
    norm = jnp.sqrt(jnp.sum(x * x, axis=-1, keepdims=True)) * (D ** -0.5)
    xn = rms_scale * x / (norm + eps)
    xn = xn * split_scale
    h = xn @ wi_weight.T
    H = wi_weight.shape[0] // 2
    main, gate = h[..., :H], h[..., H:]
    g = main * jax.nn.sigmoid(gate)
    return g @ wo_weight.T + residual


if __name__ == "__main__":
    key = jax.random.PRNGKey(0)

    # --- Case 1: module-consistent small shapes (single row tile, single
    # hidden tile -> single-buffered constant weight blocks). ---
    B, T, D, H = 2, 8, 32, 64
    k1, k2, k3, key = jax.random.split(key, 4)
    x = jax.random.normal(k1, (B, T, D), dtype=jnp.float32)
    rms_scale = jnp.ones((D,), dtype=jnp.float32)          # norm.norm.scale
    split_scale = jnp.full((D,), 0.1, dtype=jnp.float32)   # norm.scale
    wi_weight = jax.random.normal(k2, (2 * H, D), dtype=jnp.float32) * (D ** -0.5)
    wo_weight = jax.random.normal(k3, (D, H), dtype=jnp.float32) * (H ** -0.5)

    ref = swiglu_reference(x, rms_scale, split_scale, wi_weight, wo_weight)

    # bf16 MXU path (production config).
    out = swiglu_forward(x, rms_scale, split_scale, wi_weight, wo_weight)
    out = jax.block_until_ready(out)
    assert out.shape == (B, T, D)
    assert jnp.allclose(out, ref, atol=2e-2, rtol=2e-2), "bf16 mismatch vs reference"

    # fp32 path (tighter tolerance; only approx reciprocal differs from ref).
    out32 = swiglu_forward(x, rms_scale, split_scale, wi_weight, wo_weight,
                           mm_dtype=jnp.float32)
    out32 = jax.block_until_ready(out32)
    assert jnp.allclose(out32, ref, atol=5e-3, rtol=5e-3), "fp32 mismatch vs reference"

    # --- Case 2: ragged N + tiled/padded hidden dim (exercises the fp32
    # accumulator, streamed double-buffered weights, and row/H padding). ---
    Bb, Tb, Db, Hb = 2, 37, 128, 320
    k1, k2, k3, key = jax.random.split(key, 4)
    xb = jax.random.normal(k1, (Bb, Tb, Db), dtype=jnp.float32)
    rms_b = jnp.ones((Db,), dtype=jnp.float32)
    split_b = jnp.full((Db,), 0.1, dtype=jnp.float32)
    wi_b = jax.random.normal(k2, (2 * Hb, Db), dtype=jnp.float32) * (Db ** -0.5)
    wo_b = jax.random.normal(k3, (Db, Hb), dtype=jnp.float32) * (Hb ** -0.5)

    ref_b = swiglu_reference(xb, rms_b, split_b, wi_b, wo_b)
    out_b = swiglu_forward(xb, rms_b, split_b, wi_b, wo_b, tm=32, th=128)
    out_b = jax.block_until_ready(out_b)
    assert out_b.shape == (Bb, Tb, Db)
    assert jnp.allclose(out_b, ref_b, atol=2e-2, rtol=2e-2), "tiled-H mismatch vs reference"

    print("KERNEL_OK")
</pallas_src>

<mosaic_0001>
module attributes {stable_mosaic.version = 11 : i64} {
  func.func @swiglu_kernel(%arg0: i32, %arg1: i32, %arg2: memref<16x32xf32, #tpu.memory_space<vmem>>, %arg3: memref<32x64xbf16, #tpu.memory_space<vmem>>, %arg4: memref<32x64xbf16, #tpu.memory_space<vmem>>, %arg5: memref<64x32xbf16, #tpu.memory_space<vmem>>, %arg6: memref<16x32xf32, #tpu.memory_space<vmem>>, %arg7: memref<16x32xf32, #tpu.memory_space<vmem>>) attributes {dimension_semantics = [#tpu.dimension_semantics<parallel>, #tpu.dimension_semantics<arbitrary>], iteration_bounds = array<i64: 1, 1>, scalar_prefetch = 0 : i64, scratch_operands = 1 : i64, tpu.core_type = #tpu.core_type<tc>, window_params = [{transform_indices = @transform_0, window_bounds = array<i64: 16, 32>}, {pipeline_mode = #tpu.pipeline_mode<synchronous>, transform_indices = @transform_1, window_bounds = array<i64: 32, 64>}, {pipeline_mode = #tpu.pipeline_mode<synchronous>, transform_indices = @transform_2, window_bounds = array<i64: 32, 64>}, {pipeline_mode = #tpu.pipeline_mode<synchronous>, transform_indices = @transform_3, window_bounds = array<i64: 64, 32>}, {transform_indices = @transform_4, window_bounds = array<i64: 16, 32>}]} {
    %c0_i32 = arith.constant 0 : i32
    %0 = arith.cmpi eq, %arg1, %c0_i32 : i32
    %1 = arith.extui %0 : i1 to i32
    %c0_i32_0 = arith.constant 0 : i32
    %2 = arith.cmpi ne, %1, %c0_i32_0 : i32
    scf.if %2 {
      %cst_20 = arith.constant 0.000000e+00 : f32
      %35 = vector.broadcast %cst_20 : f32 to vector<16x32xf32>
      %c0_21 = arith.constant 0 : index
      %c0_22 = arith.constant 0 : index
      %36 = vector.load %arg7[%c0_21, %c0_22] : memref<16x32xf32, #tpu.memory_space<vmem>>, vector<16x32xf32>
      tpu.vector_store %arg7[%c0_21, %c0_22], %35 {strides = array<i32>} : memref<16x32xf32, #tpu.memory_space<vmem>>, vector<16x32xf32>,
    } else {
    }
    %c0 = arith.constant 0 : index
    %c0_1 = arith.constant 0 : index
    %3 = vector.load %arg2[%c0, %c0_1] : memref<16x32xf32, #tpu.memory_space<vmem>>, vector<16x32xf32>
    %4 = arith.mulf %3, %3 : vector<16x32xf32>
    %cst = arith.constant dense<0.000000e+00> : vector<16xf32>
    %5 = vector.multi_reduction <add>, %4, %cst [1] : vector<16x32xf32> to vector<16xf32>
    %6 = vector.shape_cast %5 : vector<16xf32> to vector<16x1xf32>
    %7 = math.sqrt %6 : vector<16x1xf32>
    %cst_2 = arith.constant 0.176776692 : f32
    %8 = vector.broadcast %cst_2 : f32 to vector<16x1xf32>
    %9 = arith.mulf %7, %8 : vector<16x1xf32>
    %cst_3 = arith.constant 9.99999993E-9 : f32
    %10 = vector.broadcast %cst_3 : f32 to vector<16x1xf32>
    %11 = arith.addf %9, %10 : vector<16x1xf32>
    %12 = tpu.reciprocal %11 {approx = true} : vector<16x1xf32> -> vector<16x1xf32>
    %13 = vector.broadcast %12 : vector<16x1xf32> to vector<16x32xf32>
    %14 = arith.mulf %3, %13 : vector<16x32xf32>
    %15 = arith.truncf %14 : vector<16x32xf32> to vector<16x32xbf16>
    %c0_4 = arith.constant 0 : index
    %c0_5 = arith.constant 0 : index
    %16 = vector.load %arg3[%c0_4, %c0_5] : memref<32x64xbf16, #tpu.memory_space<vmem>>, vector<32x64xbf16>
    %cst_6 = arith.constant dense<0.000000e+00> : vector<16x64xf32>
    %17 = tpu.matmul %15, %16, %cst_6 {dimension_numbers = #tpu.dot_dimension_numbers<[1], [0], [0], [1], [0, 0, 1, 1], [], []>} : vector<16x32xbf16>, vector<32x64xbf16>, vector<16x64xf32> -> vector<16x64xf32>
    %c0_7 = arith.constant 0 : index
    %c0_8 = arith.constant 0 : index
    %18 = vector.load %arg4[%c0_7, %c0_8] : memref<32x64xbf16, #tpu.memory_space<vmem>>, vector<32x64xbf16>
    %cst_9 = arith.constant dense<0.000000e+00> : vector<16x64xf32>
    %19 = tpu.matmul %15, %18, %cst_9 {dimension_numbers = #tpu.dot_dimension_numbers<[1], [0], [0], [1], [0, 0, 1, 1], [], []>} : vector<16x32xbf16>, vector<32x64xbf16>, vector<16x64xf32> -> vector<16x64xf32>
    %20 = arith.negf %19 : vector<16x64xf32>
    %21 = math.exp %20 : vector<16x64xf32>
    %cst_10 = arith.constant 1.000000e+00 : f32
    %22 = vector.broadcast %cst_10 : f32 to vector<16x64xf32>
    %23 = arith.addf %22, %21 : vector<16x64xf32>
    %24 = arith.divf %22, %23 : vector<16x64xf32>
    %25 = arith.mulf %17, %24 : vector<16x64xf32>
    %c0_11 = arith.constant 0 : index
    %c0_12 = arith.constant 0 : index
    %26 = vector.load %arg7[%c0_11, %c0_12] : memref<16x32xf32, #tpu.memory_space<vmem>>, vector<16x32xf32>
    %27 = arith.truncf %25 : vector<16x64xf32> to vector<16x64xbf16>
    %c0_13 = arith.constant 0 : index
    %c0_14 = arith.constant 0 : index
    %28 = vector.load %arg5[%c0_13, %c0_14] : memref<64x32xbf16, #tpu.memory_space<vmem>>, vector<64x32xbf16>
    %cst_15 = arith.constant dense<0.000000e+00> : vector<16x32xf32>
    %29 = tpu.matmul %27, %28, %cst_15 {dimension_numbers = #tpu.dot_dimension_numbers<[1], [0], [0], [1], [0, 0, 1, 1], [], []>} : vector<16x64xbf16>, vector<64x32xbf16>, vector<16x32xf32> -> vector<16x32xf32>
    %30 = arith.addf %26, %29 : vector<16x32xf32>
    %c0_16 = arith.constant 0 : index
    %c0_17 = arith.constant 0 : index
    %31 = vector.load %arg7[%c0_16, %c0_17] : memref<16x32xf32, #tpu.memory_space<vmem>>, vector<16x32xf32>
    tpu.vector_store %arg7[%c0_16, %c0_17], %30 {strides = array<i32>} : memref<16x32xf32, #tpu.memory_space<vmem>>, vector<16x32xf32>,
    %c0_i32_18 = arith.constant 0 : i32
    %32 = arith.cmpi eq, %arg1, %c0_i32_18 : i32
    %33 = arith.extui %32 : i1 to i32
    %c0_i32_19 = arith.constant 0 : i32
    %34 = arith.cmpi ne, %33, %c0_i32_19 : i32
    scf.if %34 {
      %c0_20 = arith.constant 0 : index
      %c0_21 = arith.constant 0 : index
      %35 = vector.load %arg7[%c0_20, %c0_21] : memref<16x32xf32, #tpu.memory_space<vmem>>, vector<16x32xf32>
      %36 = arith.addf %35, %3 : vector<16x32xf32>
      %c0_22 = arith.constant 0 : index
      %c0_23 = arith.constant 0 : index
      %37 = vector.load %arg6[%c0_22, %c0_23] : memref<16x32xf32, #tpu.memory_space<vmem>>, vector<16x32xf32>
      tpu.vector_store %arg6[%c0_22, %c0_23], %36 {strides = array<i32>} : memref<16x32xf32, #tpu.memory_space<vmem>>, vector<16x32xf32>,
    } else {
    }
    return
  }
  func.func @transform_0(%arg0: i32, %arg1: i32) -> (i32, i32) {
    %c0_i32 = arith.constant 0 : i32
    %c0_i32_0 = arith.constant 0 : i32
    return %arg0, %c0_i32 : i32, i32
  }
  func.func @transform_1(%arg0: i32, %arg1: i32) -> (i32, i32) {
    %c0_i32 = arith.constant 0 : i32
    %c0_i32_0 = arith.constant 0 : i32
    return %c0_i32, %arg1 : i32, i32
  }
  func.func @transform_2(%arg0: i32, %arg1: i32) -> (i32, i32) {
    %c0_i32 = arith.constant 0 : i32
    %c0_i32_0 = arith.constant 0 : i32
    return %c0_i32, %arg1 : i32, i32
  }
  func.func @transform_3(%arg0: i32, %arg1: i32) -> (i32, i32) {
    %c0_i32 = arith.constant 0 : i32
    %c0_i32_0 = arith.constant 0 : i32
    return %arg1, %c0_i32 : i32, i32
  }
  func.func @transform_4(%arg0: i32, %arg1: i32) -> (i32, i32) {
    %c0_i32 = arith.constant 0 : i32
    %c0_i32_0 = arith.constant 0 : i32
    return %arg0, %c0_i32 : i32, i32
  }
}

module attributes {stable_mosaic.version = 11 : i64} {
  func.func @swiglu_kernel(%arg0: i32, %arg1: i32, %arg2: memref<16x32xf32, #tpu.memory_space<vmem>>, %arg3: memref<32x64xbf16, #tpu.memory_space<vmem>>, %arg4: memref<32x64xbf16, #tpu.memory_space<vmem>>, %arg5: memref<64x32xbf16, #tpu.memory_space<vmem>>, %arg6: memref<16x32xf32, #tpu.memory_space<vmem>>, %arg7: memref<16x32xf32, #tpu.memory_space<vmem>>) attributes {dimension_semantics = [#tpu.dimension_semantics<parallel>, #tpu.dimension_semantics<arbitrary>], iteration_bounds = array<i64: 1, 1>, scalar_prefetch = 0 : i64, scratch_operands = 1 : i64, tpu.core_type = #tpu.core_type<tc>, window_params = [{transform_indices = @transform_0, window_bounds = array<i64: 16, 32>}, {transform_indices = @transform_1, window_bounds = array<i64: 32, 64>}, {transform_indices = @transform_2, window_bounds = array<i64: 32, 64>}, {transform_indices = @transform_3, window_bounds = array<i64: 64, 32>}, {transform_indices = @transform_4, window_bounds = array<i64: 16, 32>}]} {
    %c0_i32 = arith.constant 0 : i32
    %0 = arith.cmpi eq, %arg1, %c0_i32 : i32
    %1 = arith.extui %0 : i1 to i32
    %c0_i32_0 = arith.constant 0 : i32
    %2 = arith.cmpi ne, %1, %c0_i32_0 : i32
    scf.if %2 {
      %cst_20 = arith.constant 0.000000e+00 : f32
      %35 = vector.broadcast %cst_20 : f32 to vector<16x32xf32>
      %c0_21 = arith.constant 0 : index
      %c0_22 = arith.constant 0 : index
      %36 = vector.load %arg7[%c0_21, %c0_22] : memref<16x32xf32, #tpu.memory_space<vmem>>, vector<16x32xf32>
      tpu.vector_store %arg7[%c0_21, %c0_22], %35 {strides = array<i32>} : memref<16x32xf32, #tpu.memory_space<vmem>>, vector<16x32xf32>,
    } else {
    }
    %c0 = arith.constant 0 : index
    %c0_1 = arith.constant 0 : index
    %3 = vector.load %arg2[%c0, %c0_1] : memref<16x32xf32, #tpu.memory_space<vmem>>, vector<16x32xf32>
    %4 = arith.mulf %3, %3 : vector<16x32xf32>
    %cst = arith.constant dense<0.000000e+00> : vector<16xf32>
    %5 = vector.multi_reduction <add>, %4, %cst [1] : vector<16x32xf32> to vector<16xf32>
    %6 = vector.shape_cast %5 : vector<16xf32> to vector<16x1xf32>
    %7 = math.sqrt %6 : vector<16x1xf32>
    %cst_2 = arith.constant 0.176776692 : f32
    %8 = vector.broadcast %cst_2 : f32 to vector<16x1xf32>
    %9 = arith.mulf %7, %8 : vector<16x1xf32>
    %cst_3 = arith.constant 9.99999993E-9 : f32
    %10 = vector.broadcast %cst_3 : f32 to vector<16x1xf32>
    %11 = arith.addf %9, %10 : vector<16x1xf32>
    %12 = tpu.reciprocal %11 {approx = true} : vector<16x1xf32> -> vector<16x1xf32>
    %13 = vector.broadcast %12 : vector<16x1xf32> to vector<16x32xf32>
    %14 = arith.mulf %3, %13 : vector<16x32xf32>
    %15 = arith.truncf %14 : vector<16x32xf32> to vector<16x32xbf16>
    %c0_4 = arith.constant 0 : index
    %c0_5 = arith.constant 0 : index
    %16 = vector.load %arg3[%c0_4, %c0_5] : memref<32x64xbf16, #tpu.memory_space<vmem>>, vector<32x64xbf16>
    %cst_6 = arith.constant dense<0.000000e+00> : vector<16x64xf32>
    %17 = tpu.matmul %15, %16, %cst_6 {dimension_numbers = #tpu.dot_dimension_numbers<[1], [0], [0], [1], [0, 0, 1, 1], [], []>} : vector<16x32xbf16>, vector<32x64xbf16>, vector<16x64xf32> -> vector<16x64xf32>
    %c0_7 = arith.constant 0 : index
    %c0_8 = arith.constant 0 : index
    %18 = vector.load %arg4[%c0_7, %c0_8] : memref<32x64xbf16, #tpu.memory_space<vmem>>, vector<32x64xbf16>
    %cst_9 = arith.constant dense<0.000000e+00> : vector<16x64xf32>
    %19 = tpu.matmul %15, %18, %cst_9 {dimension_numbers = #tpu.dot_dimension_numbers<[1], [0], [0], [1], [0, 0, 1, 1], [], []>} : vector<16x32xbf16>, vector<32x64xbf16>, vector<16x64xf32> -> vector<16x64xf32>
    %20 = arith.negf %19 : vector<16x64xf32>
    %21 = math.exp %20 : vector<16x64xf32>
    %cst_10 = arith.constant 1.000000e+00 : f32
    %22 = vector.broadcast %cst_10 : f32 to vector<16x64xf32>
    %23 = arith.addf %22, %21 : vector<16x64xf32>
    %24 = arith.divf %22, %23 : vector<16x64xf32>
    %25 = arith.mulf %17, %24 : vector<16x64xf32>
    %c0_11 = arith.constant 0 : index
    %c0_12 = arith.constant 0 : index
    %26 = vector.load %arg7[%c0_11, %c0_12] : memref<16x32xf32, #tpu.memory_space<vmem>>, vector<16x32xf32>
    %27 = arith.truncf %25 : vector<16x64xf32> to vector<16x64xbf16>
    %c0_13 = arith.constant 0 : index
    %c0_14 = arith.constant 0 : index
    %28 = vector.load %arg5[%c0_13, %c0_14] : memref<64x32xbf16, #tpu.memory_space<vmem>>, vector<64x32xbf16>
    %cst_15 = arith.constant dense<0.000000e+00> : vector<16x32xf32>
    %29 = tpu.matmul %27, %28, %cst_15 {dimension_numbers = #tpu.dot_dimension_numbers<[1], [0], [0], [1], [0, 0, 1, 1], [], []>} : vector<16x64xbf16>, vector<64x32xbf16>, vector<16x32xf32> -> vector<16x32xf32>
    %30 = arith.addf %26, %29 : vector<16x32xf32>
    %c0_16 = arith.constant 0 : index
    %c0_17 = arith.constant 0 : index
    %31 = vector.load %arg7[%c0_16, %c0_17] : memref<16x32xf32, #tpu.memory_space<vmem>>, vector<16x32xf32>
    tpu.vector_store %arg7[%c0_16, %c0_17], %30 {strides = array<i32>} : memref<16x32xf32, #tpu.memory_space<vmem>>, vector<16x32xf32>,
    %c0_i32_18 = arith.constant 0 : i32
    %32 = arith.cmpi eq, %arg1, %c0_i32_18 : i32
    %33 = arith.extui %32 : i1 to i32
    %c0_i32_19 = arith.constant 0 : i32
    %34 = arith.cmpi ne, %33, %c0_i32_19 : i32
    scf.if %34 {
      %c0_20 = arith.constant 0 : index
      %c0_21 = arith.constant 0 : index
      %35 = vector.load %arg7[%c0_20, %c0_21] : memref<16x32xf32, #tpu.memory_space<vmem>>, vector<16x32xf32>
      %36 = arith.addf %35, %3 : vector<16x32xf32>
      %c0_22 = arith.constant 0 : index
      %c0_23 = arith.constant 0 : index
      %37 = vector.load %arg6[%c0_22, %c0_23] : memref<16x32xf32, #tpu.memory_space<vmem>>, vector<16x32xf32>
      tpu.vector_store %arg6[%c0_22, %c0_23], %36 {strides = array<i32>} : memref<16x32xf32, #tpu.memory_space<vmem>>, vector<16x32xf32>,
    } else {
    }
    return
  }
  func.func @transform_0(%arg0: i32, %arg1: i32) -> (i32, i32) {
    %c0_i32 = arith.constant 0 : i32
    %c0_i32_0 = arith.constant 0 : i32
    return %arg0, %c0_i32 : i32, i32
  }
  func.func @transform_1(%arg0: i32, %arg1: i32) -> (i32, i32) {
    %c0_i32 = arith.constant 0 : i32
    %c0_i32_0 = arith.constant 0 : i32
    return %c0_i32, %arg1 : i32, i32
  }
  func.func @transform_2(%arg0: i32, %arg1: i32) -> (i32, i32) {
    %c0_i32 = arith.constant 0 : i32
    %c0_i32_0 = arith.constant 0 : i32
    return %c0_i32, %arg1 : i32, i32
  }
  func.func @transform_3(%arg0: i32, %arg1: i32) -> (i32, i32) {
    %c0_i32 = arith.constant 0 : i32
    %c0_i32_0 = arith.constant 0 : i32
    return %arg1, %c0_i32 : i32, i32
  }
  func.func @transform_4(%arg0: i32, %arg1: i32) -> (i32, i32) {
    %c0_i32 = arith.constant 0 : i32
    %c0_i32_0 = arith.constant 0 : i32
    return %arg0, %c0_i32 : i32, i32
  }
}

</mosaic_0001>

<bundles_post_ra>
// kernel: tpu_custom_call.1
= control target key start
LH: loop header
LB: loop body
LE: loop exit
PB: predicated region body
PF: predicated region fallthrough
CT: control target
= control target key end

     0   :  { %vm23_vm0 = vcmask 261120   ;;  %s432_s0 = inlined_call_operand.vmem [shape: f32[16,32], index: 0, kind: input, shape index: {}]   ;;  %s433_s1 = inlined_call_operand.vmem [shape: bf16[32,64], index: 1, kind: input, shape index: {}]   ;;  %s434_s2 = inlined_call_operand.vmem [shape: bf16[32,64], index: 2, kind: input, shape index: {}]   ;;  %s435_s3 = inlined_call_operand.vmem [shape: bf16[64,32], index: 3, kind: input, shape index: {}]   ;;  %s436_s4 = inlined_call_operand.hbm [shape: f32[16,32], index: 4, kind: output, shape index: {}]  }
   0x1   :  { %v380_v0 = vld [vmem:[%s432_s0] sm:$0xff] }
   0x2   :  { %9 = vsyncpa [#allocation4], 0  ;;  %v28_v1 = vmul.f32 %v380_v0, %v380_v0  ;;  %v387_v2 = vld [vmem:[%s432_s0 + $0x8] sm:$0xff]  ;;  %v294_v8 = vld [vmem:[%s433_s1] sm:$0xff]  ;;  %v348_v51 = vmov 0.0   ;;  %vm208_vm13 = vcmask 523264  }
   0x3   :  { %v29_v4 = vmul.f32 %v387_v2, %v387_v2  ;;  %v295_v6 = vld [vmem:[%s433_s1 + $0x8] sm:$0xff]  ;;  %v296_v9 = vld [vmem:[%s434_s2] sm:$0xff]  ;;  %v301_v41 = vld [vmem:[%s435_s3 + $0x18] sm:$0xff]  ;;  %24 = vst.msk [vmem:[#allocation2] sm:$0xff] %vm23_vm0, %v348_v51  ;;  %s245_s9 = sshll.u32 %s436_s4, 4  ;;  %s350_s10 = smov 128   ;;  %s246_s9 = int_to_ptr.hbm [resolvable:$true] %s245_s9 }
   0x4   :  { %v31_v3 = vsel %vm23_vm0, %v28_v1, 0.0  ;;  %v297_v7 = vld [vmem:[%s434_s2 + $0x8] sm:$0xff]  ;;  %95 = vmatpush.bf16.msra.mxu0 %v295_v6  ;;  %216 = vmatpush.bf16.msra.mxu2 %v301_v41  ;;  %v300_v42 = vld [vmem:[%s435_s3 + $0x10] sm:$0xff]  ;;  %v298_v46 = vld [vmem:[%s435_s3] sm:$0xff]  ;;  %25 = vst.msk [vmem:[#allocation2 + $0x8] sm:$0xff] %vm23_vm0, %v348_v51  ;;  %s351_s11 = smov 8  }
   0x5   :  { %32 = vadd.xlane.f32.xlu0 %v31_v3  ;;  %v34_v5 = vsel %vm23_vm0, %v29_v4, 0.0  ;;  %125 = vmatpush.bf16.msra.mxu1 %v297_v7  ;;  %v299_v43 = vld [vmem:[%s435_s3 + $0x8] sm:$0xff]  ;;  %s349_s3 = smov [#allocation3]  }
   0x6   :  { %s243_s6 = sshll.u32 %s349_s3, 4  ;;  %s244_s6 = int_to_ptr.vmem [resolvable:$true] %s243_s6 }
   0x8   :  { %96 = vmatpush.bf16.msra.mxu0 %v294_v8  ;;  %217 = vmatpush.bf16.msra.mxu2 %v300_v42 }
   0x9   :  { %126 = vmatpush.bf16.msra.mxu1 %v296_v9 }
   0xc   :  { %218 = vmatpush.bf16.msra.mxu2 %v299_v43 }
   0xd   :  { %35 = vadd.xlane.f32.xlu0 %v34_v5 }
  0x10   :  { %219 = vmatpush.bf16.msra.mxu2 %v298_v46 }
  0x78   :  { %v33_v10 = vpop.xlane.xlu0 %32 }
  0x79   :  { %306 = vrsqrt.f32 %v33_v10  ;;  %vm44_vm1 = vcmp.eq.f32.partialorder %v33_v10, inf  ;;  %v47_v22 = vand.u32 2147483648, %v33_v10  ;;  %vm46_vm2 = vcmp.eq.f32.partialorder %v33_v10, 0.0 }
  0x7f   :  { %v307_v11 = vpop.eup %306 }
  0x80   :  { %v38_v12 = vmul.f32 %v307_v11, %v33_v10  ;;  %v36_v13 = vpop.xlane.xlu0 %35 }
  0x81   :  { %308 = vrsqrt.f32 %v36_v13  ;;  %vm56_vm3 = vcmp.eq.f32.partialorder %v36_v13, inf  ;;  %v59_v30 = vand.u32 2147483648, %v36_v13  ;;  %vm58_vm4 = vcmp.eq.f32.partialorder %v36_v13, 0.0 }
  0x82   :  { %v39_v14 = vmul.f32 %v307_v11, %v38_v12 }
  0x84   :  { %v40_v15 = vmul.f32 0.5, %v39_v14 }
  0x86   :  { %v41_v16 = vsub.f32 1.5, %v40_v15 }
  0x87   :  { %v309_v17 = vpop.eup %308 }
  0x88   :  { %v42_v18 = vmul.f32 %v307_v11, %v41_v16  ;;  %v50_v19 = vmul.f32 %v309_v17, %v36_v13 }
  0x8a   :  { %v43_v20 = vmul.f32 %v42_v18, %v33_v10  ;;  %v51_v21 = vmul.f32 %v309_v17, %v50_v19 }
  0x8c   :  { %v45_v23 = vsel %vm44_vm1, %v33_v10, %v43_v20  ;;  %v52_v24 = vmul.f32 0.5, %v51_v21  ;;  %v174_v20 = vld [vmem:[#allocation2 + $0x8] sm:$0xff] }
  0x8d   :  { %v48_v25 = vsel %vm46_vm2, %v47_v22, %v45_v23 }
  0x8e   :  { %v53_v26 = vsub.f32 1.5, %v52_v24  ;;  %v61_v28 = vmul.f32 0.17677669, %v48_v25 }
  0x90   :  { %v54_v27 = vmul.f32 %v309_v17, %v53_v26  ;;  %v63_v32 = vadd.f32 1e-08, %v61_v28  ;;  %v173_v17 = vld [vmem:[#allocation2] sm:$0xff] }
  0x92   :  { %v55_v29 = vmul.f32 %v54_v27, %v36_v13  ;;  %310 = vrcp.f32 %v63_v32 }
  0x94   :  { %v57_v31 = vsel %vm56_vm3, %v36_v13, %v55_v29 }
  0x95   :  { %v60_v33 = vsel %vm58_vm4, %v59_v30, %v57_v31 }
  0x96   :  { %v62_v34 = vmul.f32 0.17677669, %v60_v33 }
  0x98   :  { %v64_v35 = vadd.f32 1e-08, %v62_v34  ;;  %v311_v36 = vpop.eup %310 }
  0x99   :  { %v67_v38 = vmul.f32 %v311_v36, %v380_v0 }
  0x9a   :  { %312 = vrcp.f32 %v64_v35 }
  0xa0   :  { %v313_v37 = vpop.eup %312 }
  0xa1   :  { %v68_v39 = vmul.f32 %v313_v37, %v387_v2 }
  0xa3   :  { %v69_v40 = vpack.c.bf16 %v68_v39, %v67_v38 }
  0xa5   :  { %265 = vmatmul.msk.bf16.vlgmr.msra.gmra.mxu0 %vm23_vm0, %v69_v40  ;;  %274 = vmatmul.msk.bf16.vlgmr.msra.gmra.mxu1 %vm23_vm0, %v69_v40 }
 0x122   :  { %v128_v44 = vpop.f32.mrf.mxu1  ;;  %v98_v59 = vpop.f32.mrf.mxu0 }
 0x123   :  { %v275_v45 = vmul.f32 -1.442695, %v128_v44 }
 0x125   :  { %314 = vpow2.f32 %v275_v45 }
 0x12a   :  { %v130_v47 = vpop.f32.mrf.mxu1  ;;  %v100_v12 = vpop.f32.mrf.mxu0 }
 0x12b   :  { %v315_v48 = vpop.eup %314  ;;  %v276_v49 = vmul.f32 -1.442695, %v130_v47 }
 0x12c   :  { %v139_v50 = vadd.f32 1.0, %v315_v48 }
 0x12d   :  { %316 = vpow2.f32 %v276_v49 }
 0x12e   :  { %318 = vrcp.f32 %v139_v50  ;;  %v152_v62 = vand.u32 2147483648, %v139_v50  ;;  %vm146_vm6 = vweird.f32 %v139_v50  ;;  %v150_v1 = vand.u32 2147483647, %v139_v50 }
 0x130   :  { %v153_v7 = vor.u32 1.1754944e-38, %v152_v62  ;;  %vm151_vm9 = vcmp.eq.f32.partialorder %v150_v1, 8.507059e+37 }
 0x133   :  { %v317_v52 = vpop.eup %316 }
 0x134   :  { %v319_v53 = vpop.eup %318  ;;  %v140_v54 = vadd.f32 1.0, %v317_v52 }
 0x135   :  { %v142_v55 = vmul.f32 %v319_v53, %v139_v50  ;;  %vm147_vm5 = vweird.f32 %v319_v53 }
 0x136   :  { %320 = vrcp.f32 %v140_v54  ;;  %vm148_vm7 = vmor %vm146_vm6, %vm147_vm5  ;;  %v167_v3 = vand.u32 2147483648, %v140_v54  ;;  %v165_v6 = vand.u32 2147483647, %v140_v54  ;;  %vm161_vm10 = vweird.f32 %v140_v54 }
 0x137   :  { %v143_v56 = vsub.f32 1.0, %v142_v55 }
 0x138   :  { %v168_v10 = vor.u32 1.1754944e-38, %v167_v3  ;;  %vm166_vm12 = vcmp.eq.f32.partialorder %v165_v6, 8.507059e+37 }
 0x139   :  { %v144_v57 = vmul.f32 %v319_v53, %v143_v56 }
 0x13b   :  { %v145_v61 = vadd.f32 %v319_v53, %v144_v57 }
 0x13c   :  { %v321_v58 = vpop.eup %320 }
 0x13d   :  { %v157_v60 = vmul.f32 %v321_v58, %v140_v54  ;;  %v149_v4 = vsel %vm148_vm7, %v319_v53, %v145_v61  ;;  %vm162_vm8 = vweird.f32 %v321_v58 }
 0x13e   :  { %v154_v9 = vsel %vm151_vm9, %v153_v7, %v149_v4  ;;  %vm163_vm11 = vmor %vm161_vm10, %vm162_vm8 }
 0x13f   :  { %v158_v63 = vsub.f32 1.0, %v157_v60  ;;  %v171_v14 = vmul.f32 %v154_v9, %v98_v59 }
 0x141   :  { %v159_v5 = vmul.f32 %v321_v58, %v158_v63 }
 0x143   :  { %v160_v8 = vadd.f32 %v321_v58, %v159_v5 }
 0x145   :  { %v164_v11 = vsel %vm163_vm11, %v321_v58, %v160_v8 }
 0x146   :  { %v169_v13 = vsel %vm166_vm12, %v168_v10, %v164_v11 }
 0x147   :  { %v172_v15 = vmul.f32 %v169_v13, %v100_v12 }
 0x149   :  { %v175_v16 = vpack.c.bf16 %v172_v15, %v171_v14 }
 0x14b   :  { %293 = vmatmul.msk.bf16.vlgmr.msra.gmra.mxu2 %vm208_vm13, %v175_v16 }
 0x1ce   :  { %v221_v18 = vpop.f32.mrf.mxu2 }
 0x1cf   :  { %v226_v19 = vadd.f32 %v221_v18, %v173_v17 }
 0x1d1   :  { %228 = vst.msk [vmem:[#allocation2] sm:$0xff] %vm23_vm0, %v226_v19 }
 0x1d6   :  { %v223_v21 = vpop.f32.mrf.mxu2 }
 0x1d7   :  { %v227_v22 = vadd.f32 %v223_v21, %v174_v20 }
 0x1d8   :  { %v233_v23 = vld [vmem:[#allocation2] sm:$0xff] }
 0x1d9   :  { %229 = vst.msk [vmem:[#allocation2 + $0x8] sm:$0xff] %vm23_vm0, %v227_v22  ;;  %v235_v24 = vadd.f32 %v233_v23, %v380_v0 }
 0x1db   :  { %237 = vst.msk [vmem:[#allocation3] sm:$0xff] %vm23_vm0, %v235_v24 }
 0x1e0   :  { %v234_v25 = vld [vmem:[#allocation2 + $0x8] sm:$0xff] }
 0x1e1   :  { %v236_v26 = vadd.f32 %v234_v25, %v387_v2 }
 0x1e3   :  { %238 = vst.msk [vmem:[#allocation3 + $0x8] sm:$0xff] %vm23_vm0, %v236_v26 }
 0x1e4   :  { %251 = dma.vmem_to_hbm [thread:$0]  %s244_s6, 256, %s246_s9, [#allocation4], %s350_s10, %s350_s10, %s351_s11  }
 0x1e5   :  { %346 = dma.done.wait [#allocation4], 256  }
 0x1e6   :  { %347 = vsyncadd [#allocation4], 4294967040 }
 0x1e7   :  { %256 = vsyncpa [#allocation4], 1 }

// kernel: tpu_custom_call.1
= control target key start
LH: loop header
LB: loop body
LE: loop exit
PB: predicated region body
PF: predicated region fallthrough
CT: control target
= control target key end

     0   :  { %vm23_vm0 = vcmask 261120   ;;  %s432_s0 = inlined_call_operand.vmem [shape: f32[16,32], index: 0, kind: input, shape index: {}]   ;;  %s433_s1 = inlined_call_operand.vmem [shape: bf16[32,64], index: 1, kind: input, shape index: {}]   ;;  %s434_s2 = inlined_call_operand.vmem [shape: bf16[32,64], index: 2, kind: input, shape index: {}]   ;;  %s435_s3 = inlined_call_operand.vmem [shape: bf16[64,32], index: 3, kind: input, shape index: {}]   ;;  %s436_s4 = inlined_call_operand.hbm [shape: f32[16,32], index: 4, kind: output, shape index: {}]  }
   0x1   :  { %v380_v0 = vld [vmem:[%s432_s0] sm:$0xff] }
   0x2   :  { %9 = vsyncpa [#allocation4], 0  ;;  %v28_v1 = vmul.f32 %v380_v0, %v380_v0  ;;  %v387_v2 = vld [vmem:[%s432_s0 + $0x8] sm:$0xff]  ;;  %v294_v8 = vld [vmem:[%s433_s1] sm:$0xff]  ;;  %v348_v51 = vmov 0.0   ;;  %vm208_vm13 = vcmask 523264  }
   0x3   :  { %v29_v4 = vmul.f32 %v387_v2, %v387_v2  ;;  %v295_v6 = vld [vmem:[%s433_s1 + $0x8] sm:$0xff]  ;;  %v296_v9 = vld [vmem:[%s434_s2] sm:$0xff]  ;;  %v301_v41 = vld [vmem:[%s435_s3 + $0x18] sm:$0xff]  ;;  %24 = vst.msk [vmem:[#allocation2] sm:$0xff] %vm23_vm0, %v348_v51  ;;  %s245_s9 = sshll.u32 %s436_s4, 4  ;;  %s350_s10 = smov 128   ;;  %s246_s9 = int_to_ptr.hbm [resolvable:$true] %s245_s9 }
   0x4   :  { %v31_v3 = vsel %vm23_vm0, %v28_v1, 0.0  ;;  %v297_v7 = vld [vmem:[%s434_s2 + $0x8] sm:$0xff]  ;;  %95 = vmatpush.bf16.msra.mxu0 %v295_v6  ;;  %216 = vmatpush.bf16.msra.mxu2 %v301_v41  ;;  %v300_v42 = vld [vmem:[%s435_s3 + $0x10] sm:$0xff]  ;;  %v298_v46 = vld [vmem:[%s435_s3] sm:$0xff]  ;;  %25 = vst.msk [vmem:[#allocation2 + $0x8] sm:$0xff] %vm23_vm0, %v348_v51  ;;  %s351_s11 = smov 8  }
   0x5   :  { %32 = vadd.xlane.f32.xlu0 %v31_v3  ;;  %v34_v5 = vsel %vm23_vm0, %v29_v4, 0.0  ;;  %125 = vmatpush.bf16.msra.mxu1 %v297_v7  ;;  %v299_v43 = vld [vmem:[%s435_s3 + $0x8] sm:$0xff]  ;;  %s349_s3 = smov [#allocation3]  }
   0x6   :  { %s243_s6 = sshll.u32 %s349_s3, 4  ;;  %s244_s6 = int_to_ptr.vmem [resolvable:$true] %s243_s6 }
   0x8   :  { %96 = vmatpush.bf16.msra.mxu0 %v294_v8  ;;  %217 = vmatpush.bf16.msra.mxu2 %v300_v42 }
   0x9   :  { %126 = vmatpush.bf16.msra.mxu1 %v296_v9 }
   0xc   :  { %218 = vmatpush.bf16.msra.mxu2 %v299_v43 }
   0xd   :  { %35 = vadd.xlane.f32.xlu0 %v34_v5 }
  0x10   :  { %219 = vmatpush.bf16.msra.mxu2 %v298_v46 }
  0x78   :  { %v33_v10 = vpop.xlane.xlu0 %32 }
  0x79   :  { %306 = vrsqrt.f32 %v33_v10  ;;  %vm44_vm1 = vcmp.eq.f32.partialorder %v33_v10, inf  ;;  %v47_v22 = vand.u32 2147483648, %v33_v10  ;;  %vm46_vm2 = vcmp.eq.f32.partialorder %v33_v10, 0.0 }
  0x7f   :  { %v307_v11 = vpop.eup %306 }
  0x80   :  { %v38_v12 = vmul.f32 %v307_v11, %v33_v10  ;;  %v36_v13 = vpop.xlane.xlu0 %35 }
  0x81   :  { %308 = vrsqrt.f32 %v36_v13  ;;  %vm56_vm3 = vcmp.eq.f32.partialorder %v36_v13, inf  ;;  %v59_v30 = vand.u32 2147483648, %v36_v13  ;;  %vm58_vm4 = vcmp.eq.f32.partialorder %v36_v13, 0.0 }
  0x82   :  { %v39_v14 = vmul.f32 %v307_v11, %v38_v12 }
  0x84   :  { %v40_v15 = vmul.f32 0.5, %v39_v14 }
  0x86   :  { %v41_v16 = vsub.f32 1.5, %v40_v15 }
  0x87   :  { %v309_v17 = vpop.eup %308 }
  0x88   :  { %v42_v18 = vmul.f32 %v307_v11, %v41_v16  ;;  %v50_v19 = vmul.f32 %v309_v17, %v36_v13 }
  0x8a   :  { %v43_v20 = vmul.f32 %v42_v18, %v33_v10  ;;  %v51_v21 = vmul.f32 %v309_v17, %v50_v19 }
  0x8c   :  { %v45_v23 = vsel %vm44_vm1, %v33_v10, %v43_v20  ;;  %v52_v24 = vmul.f32 0.5, %v51_v21  ;;  %v174_v20 = vld [vmem:[#allocation2 + $0x8] sm:$0xff] }
  0x8d   :  { %v48_v25 = vsel %vm46_vm2, %v47_v22, %v45_v23 }
  0x8e   :  { %v53_v26 = vsub.f32 1.5, %v52_v24  ;;  %v61_v28 = vmul.f32 0.17677669, %v48_v25 }
  0x90   :  { %v54_v27 = vmul.f32 %v309_v17, %v53_v26  ;;  %v63_v32 = vadd.f32 1e-08, %v61_v28  ;;  %v173_v17 = vld [vmem:[#allocation2] sm:$0xff] }
  0x92   :  { %v55_v29 = vmul.f32 %v54_v27, %v36_v13  ;;  %310 = vrcp.f32 %v63_v32 }
  0x94   :  { %v57_v31 = vsel %vm56_vm3, %v36_v13, %v55_v29 }
  0x95   :  { %v60_v33 = vsel %vm58_vm4, %v59_v30, %v57_v31 }
  0x96   :  { %v62_v34 = vmul.f32 0.17677669, %v60_v33 }
  0x98   :  { %v64_v35 = vadd.f32 1e-08, %v62_v34  ;;  %v311_v36 = vpop.eup %310 }
  0x99   :  { %v67_v38 = vmul.f32 %v311_v36, %v380_v0 }
  0x9a   :  { %312 = vrcp.f32 %v64_v35 }
  0xa0   :  { %v313_v37 = vpop.eup %312 }
  0xa1   :  { %v68_v39 = vmul.f32 %v313_v37, %v387_v2 }
  0xa3   :  { %v69_v40 = vpack.c.bf16 %v68_v39, %v67_v38 }
  0xa5   :  { %265 = vmatmul.msk.bf16.vlgmr.msra.gmra.mxu0 %vm23_vm0, %v69_v40  ;;  %274 = vmatmul.msk.bf16.vlgmr.msra.gmra.mxu1 %vm23_vm0, %v69_v40 }
 0x122   :  { %v128_v44 = vpop.f32.mrf.mxu1  ;;  %v98_v59 = vpop.f32.mrf.mxu0 }
 0x123   :  { %v275_v45 = vmul.f32 -1.442695, %v128_v44 }
 0x125   :  { %314 = vpow2.f32 %v275_v45 }
 0x12a   :  { %v130_v47 = vpop.f32.mrf.mxu1  ;;  %v100_v12 = vpop.f32.mrf.mxu0 }
 0x12b   :  { %v315_v48 = vpop.eup %314  ;;  %v276_v49 = vmul.f32 -1.442695, %v130_v47 }
 0x12c   :  { %v139_v50 = vadd.f32 1.0, %v315_v48 }
 0x12d   :  { %316 = vpow2.f32 %v276_v49 }
 0x12e   :  { %318 = vrcp.f32 %v139_v50  ;;  %v152_v62 = vand.u32 2147483648, %v139_v50  ;;  %vm146_vm6 = vweird.f32 %v139_v50  ;;  %v150_v1 = vand.u32 2147483647, %v139_v50 }
 0x130   :  { %v153_v7 = vor.u32 1.1754944e-38, %v152_v62  ;;  %vm151_vm9 = vcmp.eq.f32.partialorder %v150_v1, 8.507059e+37 }
 0x133   :  { %v317_v52 = vpop.eup %316 }
 0x134   :  { %v319_v53 = vpop.eup %318  ;;  %v140_v54 = vadd.f32 1.0, %v317_v52 }
 0x135   :  { %v142_v55 = vmul.f32 %v319_v53, %v139_v50  ;;  %vm147_vm5 = vweird.f32 %v319_v53 }
 0x136   :  { %320 = vrcp.f32 %v140_v54  ;;  %vm148_vm7 = vmor %vm146_vm6, %vm147_vm5  ;;  %v167_v3 = vand.u32 2147483648, %v140_v54  ;;  %v165_v6 = vand.u32 2147483647, %v140_v54  ;;  %vm161_vm10 = vweird.f32 %v140_v54 }
 0x137   :  { %v143_v56 = vsub.f32 1.0, %v142_v55 }
 0x138   :  { %v168_v10 = vor.u32 1.1754944e-38, %v167_v3  ;;  %vm166_vm12 = vcmp.eq.f32.partialorder %v165_v6, 8.507059e+37 }
 0x139   :  { %v144_v57 = vmul.f32 %v319_v53, %v143_v56 }
 0x13b   :  { %v145_v61 = vadd.f32 %v319_v53, %v144_v57 }
 0x13c   :  { %v321_v58 = vpop.eup %320 }
 0x13d   :  { %v157_v60 = vmul.f32 %v321_v58, %v140_v54  ;;  %v149_v4 = vsel %vm148_vm7, %v319_v53, %v145_v61  ;;  %vm162_vm8 = vweird.f32 %v321_v58 }
 0x13e   :  { %v154_v9 = vsel %vm151_vm9, %v153_v7, %v149_v4  ;;  %vm163_vm11 = vmor %vm161_vm10, %vm162_vm8 }
 0x13f   :  { %v158_v63 = vsub.f32 1.0, %v157_v60  ;;  %v171_v14 = vmul.f32 %v154_v9, %v98_v59 }
 0x141   :  { %v159_v5 = vmul.f32 %v321_v58, %v158_v63 }
 0x143   :  { %v160_v8 = vadd.f32 %v321_v58, %v159_v5 }
 0x145   :  { %v164_v11 = vsel %vm163_vm11, %v321_v58, %v160_v8 }
 0x146   :  { %v169_v13 = vsel %vm166_vm12, %v168_v10, %v164_v11 }
 0x147   :  { %v172_v15 = vmul.f32 %v169_v13, %v100_v12 }
 0x149   :  { %v175_v16 = vpack.c.bf16 %v172_v15, %v171_v14 }
 0x14b   :  { %293 = vmatmul.msk.bf16.vlgmr.msra.gmra.mxu2 %vm208_vm13, %v175_v16 }
 0x1ce   :  { %v221_v18 = vpop.f32.mrf.mxu2 }
 0x1cf   :  { %v226_v19 = vadd.f32 %v221_v18, %v173_v17 }
 0x1d1   :  { %228 = vst.msk [vmem:[#allocation2] sm:$0xff] %vm23_vm0, %v226_v19 }
 0x1d6   :  { %v223_v21 = vpop.f32.mrf.mxu2 }
 0x1d7   :  { %v227_v22 = vadd.f32 %v223_v21, %v174_v20 }
 0x1d8   :  { %v233_v23 = vld [vmem:[#allocation2] sm:$0xff] }
 0x1d9   :  { %229 = vst.msk [vmem:[#allocation2 + $0x8] sm:$0xff] %vm23_vm0, %v227_v22  ;;  %v235_v24 = vadd.f32 %v233_v23, %v380_v0 }
 0x1db   :  { %237 = vst.msk [vmem:[#allocation3] sm:$0xff] %vm23_vm0, %v235_v24 }
 0x1e0   :  { %v234_v25 = vld [vmem:[#allocation2 + $0x8] sm:$0xff] }
 0x1e1   :  { %v236_v26 = vadd.f32 %v234_v25, %v387_v2 }
 0x1e3   :  { %238 = vst.msk [vmem:[#allocation3 + $0x8] sm:$0xff] %vm23_vm0, %v236_v26 }
 0x1e4   :  { %251 = dma.vmem_to_hbm [thread:$0]  %s244_s6, 256, %s246_s9, [#allocation4], %s350_s10, %s350_s10, %s351_s11  }
 0x1e5   :  { %346 = dma.done.wait [#allocation4], 256  }
 0x1e6   :  { %347 = vsyncadd [#allocation4], 4294967040 }
 0x1e7   :  { %256 = vsyncpa [#allocation4], 1 }

</bundles_post_ra>
